<compile_context>
chip_gen: v6e
topology: v6e:2x2x1
jax: 0.10.0
libtpu: 0.0.40
codegen_flags: <defaults>
</compile_context>

<pallas_src>
import functools

import jax
import jax.numpy as jnp
from jax.experimental import pallas as pl
from jax.experimental.pallas import tpu as pltpu


def _qactivation_kernel(x_ref, or_ref, oi_ref, *, n):
    # x_ref block: (2, TB, N*N); x_ref[0] = real rows, x_ref[1] = imag rows.
    xr = x_ref[0]                                   # (TB, NN)
    xi = x_ref[1]                                   # (TB, NN)
    nn_lanes = xr.shape[-1]

    # Diagonal element (k, k) of the row-major-flattened (N, N) matrix sits at
    # lane j = k*(N+1).  Build the mask at broadcast width (1, NN): one vreg
    # row of iota/mod/cmp instead of TB/8 full-width vregs every grid step.
    lane = jax.lax.broadcasted_iota(jnp.int32, (1, nn_lanes), 1)
    is_diag = (lane % (n + 1)) == 0                 # (1, NN) — broadcasts below

    neg_inf = jnp.float32(-jnp.inf)
    diag_vals = jnp.where(is_diag, xr, neg_inf)     # off-diag lanes -> -inf

    # Row-wise numerically-stable softmax restricted to the diagonal lanes.
    m = jnp.max(diag_vals, axis=-1, keepdims=True)              # (TB, 1)
    # exp(-inf) == 0, so off-diagonal lanes are exactly 0 without a select.
    e = jnp.exp(diag_vals - m)                                  # (TB, NN)
    denom = jnp.sum(e, axis=-1, keepdims=True)                  # (TB, 1), >= 1

    # Approx reciprocal (EUP slot) + one Newton-Raphson step ≈ full f32
    # precision without the long VALU divide sequence.
    inv_denom = pl.reciprocal(denom, approx=True)
    inv_denom = inv_denom * (2.0 - denom * inv_denom)
    p = e * inv_denom                   # softmax(diag) on diag lanes, 0 elsewhere

    # max_ratio = max_k diag_k / softmax(diag)_k.  Avoid a full-width f32
    # divide via the identity 1 / p_k = denom * exp(m - diag_k).  The exp
    # argument is masked to 0 off-diagonal so it cannot overflow pre-select.
    exp_arg = jnp.where(is_diag, m - xr, 0.0)
    ratio = jnp.where(is_diag, xr * denom * jnp.exp(exp_arg), neg_inf)
    max_ratio = jnp.max(ratio, axis=-1, keepdims=True)          # (TB, 1)
    # NOTE: as in the PyTorch source, max_ratio can be <= 0 for all-nonpositive
    # diagonals; we faithfully reproduce that (inherited) behavior.
    inv_mr = pl.reciprocal(max_ratio, approx=True)
    inv_mr = inv_mr * (2.0 - max_ratio * inv_mr)

    # Off-diagonal: x / max_ratio.  Real diagonal: softmax values.  Imag diag: 0.
    or_ref[...] = jnp.where(is_diag, p, xr * inv_mr)
    oi_ref[...] = jnp.where(is_diag, 0.0, xi * inv_mr)


def _round_up(v, m):
    return ((v + m - 1) // m) * m


# Tile sizing: 2048 rows -> per-step I/O = 2*TB*NN*4 (in) + 2*TB*NN*4 (out)
# ≈ 8 MiB, ~16 MiB double-buffered; well under the 48 MiB scoped-VMEM limit we
# request (v5e/v6e physical 128 MiB, v7x physical 64 MiB).
_DEF_BLOCK_ROWS = 2048
_VMEM_LIMIT_BYTES = 48 << 20
_MIN_STEP_ROWS = 256   # never shrink a step below this just to get more steps


def qactivation(x, *, block_rows=_DEF_BLOCK_ROWS):
    """x: (2, B, C, N, N) float32 -> [real (B, C, N, N), imag (B, C, N, N)]."""
    two, B, C, N, N2 = x.shape
    assert two == 2 and N == N2
    BC = B * C
    NN = N * N

    # Free reshape of the contiguous input; keeps real+imag in one HBM operand
    # (the kernel block spans the leading size-2 axis), so no slice copies.
    xf = x.reshape(2, BC, NN)

    # Tile selection:
    #  - tb == BC (full extent) is always a legal block shape;
    #  - otherwise tb is a multiple of 8 (ragged last block handled by Pallas);
    #  - if a single step would cover everything but there are enough rows,
    #    split into >=2 steps so the "parallel" axis shards across v7x's 2 TCs.
    tb = min(block_rows, BC)
    if tb == BC and BC >= 2 * _MIN_STEP_ROWS:
        tb = _round_up(pl.cdiv(BC, 2), 8)
    grid = (pl.cdiv(BC, tb),)

    kernel = functools.partial(_qactivation_kernel, n=N)

    out_r, out_i = pl.pallas_call(
        kernel,
        grid=grid,
        in_specs=[pl.BlockSpec((2, tb, NN), lambda i: (0, i, 0))],
        out_specs=[
            pl.BlockSpec((tb, NN), lambda i: (i, 0)),
            pl.BlockSpec((tb, NN), lambda i: (i, 0)),
        ],
        out_shape=[
            jax.ShapeDtypeStruct((BC, NN), x.dtype),
            jax.ShapeDtypeStruct((BC, NN), x.dtype),
        ],
        compiler_params=pltpu.CompilerParams(
            dimension_semantics=("parallel",),
            vmem_limit_bytes=_VMEM_LIMIT_BYTES,
        ),
    )(xf)

    return [out_r.reshape(B, C, N, N), out_i.reshape(B, C, N, N)]


def qactivation_ref(x):
    """Pure-JAX reference mirroring the PyTorch forward."""
    x_real, x_imag = x[0], x[1]
    diag = jnp.diagonal(x_real, 0, 2, 3)                      # (B, C, N)
    new_diag = jax.nn.softmax(diag, axis=-1)
    max_ratio = jnp.max(diag / new_diag, axis=-1)             # (B, C)
    mr = max_ratio[..., None, None]
    x_real = x_real / mr
    x_imag = x_imag / mr
    N = x_real.shape[3]
    eye = jnp.eye(N, dtype=x.dtype)
    mask = 1.0 - eye
    x_real = x_real * mask + new_diag[..., :, None] * eye
    x_imag = x_imag * mask
    return [x_real, x_imag]


if __name__ == "__main__":
    key = jax.random.PRNGKey(0)
    B, C, N = 2, 4, 16
    x = jax.random.normal(key, (2, B, C, N, N), dtype=jnp.float32)

    out_r, out_i = qactivation(x)
    out_r = jax.block_until_ready(out_r)
    out_i = jax.block_until_ready(out_i)

    ref_r, ref_i = qactivation_ref(x)
    assert jnp.allclose(out_r, ref_r, atol=1e-5, rtol=1e-5)
    assert jnp.allclose(out_i, ref_i, atol=1e-5, rtol=1e-5)

    print("KERNEL_OK")
</pallas_src>

<mosaic_0001>
module attributes {stable_mosaic.version = 11 : i64} {
  func.func @_qactivation_kernel(%arg0: i32, %arg1: memref<2x8x256xf32, #tpu.memory_space<vmem>>, %arg2: memref<8x256xf32, #tpu.memory_space<vmem>>, %arg3: memref<8x256xf32, #tpu.memory_space<vmem>>) attributes {dimension_semantics = [#tpu.dimension_semantics<parallel>], iteration_bounds = array<i64: 1>, scalar_prefetch = 0 : i64, scratch_operands = 0 : i64, tpu.core_type = #tpu.core_type<tc>, window_params = [{transform_indices = @transform_0, window_bounds = array<i64: 2, 8, 256>}, {transform_indices = @transform_1, window_bounds = array<i64: 8, 256>}, {transform_indices = @transform_2, window_bounds = array<i64: 8, 256>}]} {
    %c0 = arith.constant 0 : index
    %c0_0 = arith.constant 0 : index
    %c0_1 = arith.constant 0 : index
    %0 = vector.load %arg1[%c0, %c0_0, %c0_1] : memref<2x8x256xf32, #tpu.memory_space<vmem>>, vector<1x8x256xf32>
    %1 = vector.shape_cast %0 : vector<1x8x256xf32> to vector<8x256xf32>
    %c1 = arith.constant 1 : index
    %c0_2 = arith.constant 0 : index
    %c0_3 = arith.constant 0 : index
    %2 = vector.load %arg1[%c1, %c0_2, %c0_3] : memref<2x8x256xf32, #tpu.memory_space<vmem>>, vector<1x8x256xf32>
    %3 = vector.shape_cast %2 : vector<1x8x256xf32> to vector<8x256xf32>
    %4 = tpu.iota {dimensions = array<i32: 1>} : vector<1x256xi32>
    %c17_i32 = arith.constant 17 : i32
    %c0_i32 = arith.constant 0 : i32
    %5 = arith.cmpi eq, %c17_i32, %c0_i32 : i32
    %c1_i32 = arith.constant 1 : i32
    %6 = arith.select %5, %c1_i32, %c17_i32 : i32
    %7 = vector.broadcast %6 : i32 to vector<1x256xi32>
    %8 = arith.remsi %4, %7 : vector<1x256xi32>
    %c0_i32_4 = arith.constant 0 : i32
    %9 = vector.broadcast %c0_i32_4 : i32 to vector<1x256xi32>
    %10 = arith.cmpi ne, %8, %9 : vector<1x256xi32>
    %c0_i32_5 = arith.constant 0 : i32
    %11 = vector.broadcast %c0_i32_5 : i32 to vector<1x256xi32>
    %12 = arith.cmpi slt, %8, %11 : vector<1x256xi32>
    %c0_i32_6 = arith.constant 0 : i32
    %13 = arith.cmpi slt, %6, %c0_i32_6 : i32
    %14 = vector.broadcast %13 : i1 to vector<1x256xi1>
    %15 = vector.broadcast %14 : vector<1x256xi1> to vector<1x256xi1>
    %16 = arith.xori %12, %15 : vector<1x256xi1>
    %17 = arith.andi %16, %10 : vector<1x256xi1>
    %18 = vector.broadcast %6 : i32 to vector<1x256xi32>
    %19 = arith.addi %8, %18 : vector<1x256xi32>
    %20 = arith.select %17, %19, %8 : vector<1x256xi1>, vector<1x256xi32>
    %c0_i32_7 = arith.constant 0 : i32
    %21 = vector.broadcast %c0_i32_7 : i32 to vector<1x256xi32>
    %22 = arith.cmpi eq, %20, %21 : vector<1x256xi32>
    %cst = arith.constant 0xFF800000 : f32
    %23 = vector.shape_cast %22 : vector<1x256xi1> to vector<1x256xi1>
    %24 = vector.broadcast %23 : vector<1x256xi1> to vector<8x256xi1>
    %25 = vector.broadcast %cst : f32 to vector<8x256xf32>
    %26 = arith.select %24, %1, %25 : vector<8x256xi1>, vector<8x256xf32>
    %cst_8 = arith.constant dense<0xFF800000> : vector<8xf32>
    %27 = vector.multi_reduction <maximumf>, %26, %cst_8 [1] : vector<8x256xf32> to vector<8xf32>
    %28 = vector.shape_cast %27 : vector<8xf32> to vector<8x1xf32>
    %29 = vector.broadcast %28 : vector<8x1xf32> to vector<8x256xf32>
    %30 = arith.subf %26, %29 : vector<8x256xf32>
    %31 = math.exp %30 : vector<8x256xf32>
    %cst_9 = arith.constant dense<0.000000e+00> : vector<8xf32>
    %32 = vector.multi_reduction <add>, %31, %cst_9 [1] : vector<8x256xf32> to vector<8xf32>
    %33 = vector.shape_cast %32 : vector<8xf32> to vector<8x1xf32>
    %34 = tpu.reciprocal %33 {approx = true} : vector<8x1xf32> -> vector<8x1xf32>
    %35 = arith.mulf %33, %34 : vector<8x1xf32>
    %cst_10 = arith.constant 2.000000e+00 : f32
    %36 = vector.broadcast %cst_10 : f32 to vector<8x1xf32>
    %37 = arith.subf %36, %35 : vector<8x1xf32>
    %38 = arith.mulf %34, %37 : vector<8x1xf32>
    %39 = vector.broadcast %38 : vector<8x1xf32> to vector<8x256xf32>
    %40 = arith.mulf %31, %39 : vector<8x256xf32>
    %41 = vector.broadcast %28 : vector<8x1xf32> to vector<8x256xf32>
    %42 = arith.subf %41, %1 : vector<8x256xf32>
    %cst_11 = arith.constant 0.000000e+00 : f32
    %43 = vector.shape_cast %22 : vector<1x256xi1> to vector<1x256xi1>
    %44 = vector.broadcast %43 : vector<1x256xi1> to vector<8x256xi1>
    %45 = vector.broadcast %cst_11 : f32 to vector<8x256xf32>
    %46 = arith.select %44, %42, %45 : vector<8x256xi1>, vector<8x256xf32>
    %47 = vector.broadcast %33 : vector<8x1xf32> to vector<8x256xf32>
    %48 = arith.mulf %1, %47 : vector<8x256xf32>
    %49 = math.exp %46 : vector<8x256xf32>
    %50 = arith.mulf %48, %49 : vector<8x256xf32>
    %cst_12 = arith.constant 0xFF800000 : f32
    %51 = vector.shape_cast %22 : vector<1x256xi1> to vector<1x256xi1>
    %52 = vector.broadcast %51 : vector<1x256xi1> to vector<8x256xi1>
    %53 = vector.broadcast %cst_12 : f32 to vector<8x256xf32>
    %54 = arith.select %52, %50, %53 : vector<8x256xi1>, vector<8x256xf32>
    %cst_13 = arith.constant dense<0xFF800000> : vector<8xf32>
    %55 = vector.multi_reduction <maximumf>, %54, %cst_13 [1] : vector<8x256xf32> to vector<8xf32>
    %56 = vector.shape_cast %55 : vector<8xf32> to vector<8x1xf32>
    %57 = tpu.reciprocal %56 {approx = true} : vector<8x1xf32> -> vector<8x1xf32>
    %58 = arith.mulf %56, %57 : vector<8x1xf32>
    %cst_14 = arith.constant 2.000000e+00 : f32
    %59 = vector.broadcast %cst_14 : f32 to vector<8x1xf32>
    %60 = arith.subf %59, %58 : vector<8x1xf32>
    %61 = arith.mulf %57, %60 : vector<8x1xf32>
    %62 = vector.broadcast %61 : vector<8x1xf32> to vector<8x256xf32>
    %63 = arith.mulf %1, %62 : vector<8x256xf32>
    %64 = vector.shape_cast %22 : vector<1x256xi1> to vector<1x256xi1>
    %65 = vector.broadcast %64 : vector<1x256xi1> to vector<8x256xi1>
    %66 = arith.select %65, %40, %63 : vector<8x256xi1>, vector<8x256xf32>
    %c0_15 = arith.constant 0 : index
    %c0_16 = arith.constant 0 : index
    %67 = vector.load %arg2[%c0_15, %c0_16] : memref<8x256xf32, #tpu.memory_space<vmem>>, vector<8x256xf32>
    tpu.vector_store %arg2[%c0_15, %c0_16], %66 {strides = array<i32>} : memref<8x256xf32, #tpu.memory_space<vmem>>, vector<8x256xf32>,
    %68 = vector.broadcast %61 : vector<8x1xf32> to vector<8x256xf32>
    %69 = arith.mulf %3, %68 : vector<8x256xf32>
    %cst_17 = arith.constant 0.000000e+00 : f32
    %70 = vector.shape_cast %22 : vector<1x256xi1> to vector<1x256xi1>
    %71 = vector.broadcast %70 : vector<1x256xi1> to vector<8x256xi1>
    %72 = vector.broadcast %cst_17 : f32 to vector<8x256xf32>
    %73 = arith.select %71, %72, %69 : vector<8x256xi1>, vector<8x256xf32>
    %c0_18 = arith.constant 0 : index
    %c0_19 = arith.constant 0 : index
    %74 = vector.load %arg3[%c0_18, %c0_19] : memref<8x256xf32, #tpu.memory_space<vmem>>, vector<8x256xf32>
    tpu.vector_store %arg3[%c0_18, %c0_19], %73 {strides = array<i32>} : memref<8x256xf32, #tpu.memory_space<vmem>>, vector<8x256xf32>,
    return
  }
  func.func @transform_0(%arg0: i32) -> (i32, i32, i32) {
    %c0_i32 = arith.constant 0 : i32
    %c0_i32_0 = arith.constant 0 : i32
    %c0_i32_1 = arith.constant 0 : i32
    return %c0_i32, %arg0, %c0_i32_0 : i32, i32, i32
  }
  func.func @transform_1(%arg0: i32) -> (i32, i32) {
    %c0_i32 = arith.constant 0 : i32
    %c0_i32_0 = arith.constant 0 : i32
    return %arg0, %c0_i32 : i32, i32
  }
  func.func @transform_2(%arg0: i32) -> (i32, i32) {
    %c0_i32 = arith.constant 0 : i32
    %c0_i32_0 = arith.constant 0 : i32
    return %arg0, %c0_i32 : i32, i32
  }
}

</mosaic_0001>

<bundles_post_ra>
// kernel: tpu_custom_call.1
= control target key start
LH: loop header
LB: loop body
LE: loop exit
PB: predicated region body
PF: predicated region fallthrough
CT: control target
= control target key end

     0   :  { %8 = vsyncpa [#allocation3], 0  ;;  %s312_s0 = inlined_call_operand.hbm [shape: f32[2,8,256], index: 0, kind: input, shape index: {}]   ;;  %s313_s1 = inlined_call_operand.hbm [shape: f32[8,256], index: 1, kind: output, shape index: {0}]   ;;  %s314_s2 = inlined_call_operand.hbm [shape: f32[8,256], index: 2, kind: output, shape index: {1}]  }
   0x1   :  { %9 = vsyncpa [#allocation4], 0 }
   0x2   :  { %10 = vsyncpa [#allocation7], 0  ;;  %s241_s9 = smov [#allocation2]  }
   0x3   :  { %s16_s10 = sshll.u32 %s241_s9, 4  ;;  %s17_s10 = int_to_ptr.vmem [resolvable:$true] %s16_s10 }
   0x4   :  { %s183_s11 = scalar_lea.vmem %s17_s10, 512  ;;  %p188_p1 = scmp.lt.s32.totalorder %s17_s10, %s17_s10 }
   0x5   :  { %p184_p0 = scmp.ne.s32.totalorder %s17_s10, %s183_s11  ;;  %p189_p2 = scmp.lt.s32.totalorder %s183_s11, %s183_s11 }
   0x7   :  { %p190_p3 = por %p189_p2, %p188_p1 }
   0x9   :  { %p191_p4 = pnand %p190_p3, %p184_p0 }
   0xb   :  { %194 = shalt.err (!%p191_p4)
}
   0xc   :  { %s242_s12 = smov 256   ;;  %s243_s13 = smov 16  }
   0xd   :  { %22 = dma.hbm_to_vmem [thread:$0]  %s312_s0, 512, %s17_s10, [#allocation3], %s242_s12, %s242_s12, %s243_s13  }
   0xe   :  { %235 = dma.done.wait [#allocation3], 512  }
   0xf   :  { %236 = vsyncadd [#allocation3], 4294966784  ;;  %v31_v0 = vlaneseq  ;;  %v272_v14 = vld [vmem:[#allocation2] sm:$0xff]  ;;  %v27_v17 = vld [vmem:[#allocation2 + $0x8] sm:$0xff]  ;;  %s244_s0 = smov [#allocation5]   ;;  %s245_s17 = smov [#allocation6]  }
  0x10   :  { %v29_v56 = vld [vmem:[#allocation2 + $0x10] sm:$0xff]  ;;  %v30_v57 = vld [vmem:[#allocation2 + $0x18] sm:$0xff]  ;;  %s131_s16 = sshll.u32 %s244_s0, 4  ;;  %s141_s18 = sshll.u32 %s245_s17, 4  ;;  %s132_s16 = int_to_ptr.vmem [resolvable:$true] %s131_s16  ;;  %s142_s18 = int_to_ptr.vmem [resolvable:$true] %s141_s18 }
  0x11   :  { %v32_v1 = vand.u32 127, %v31_v0  ;;  %s195_s19 = scalar_lea.vmem %s132_s16, 256  ;;  %p200_p6 = scmp.lt.s32.totalorder %s132_s16, %s132_s16 }
  0x12   :  { %p196_p5 = scmp.ne.s32.totalorder %s132_s16, %s195_s19  ;;  %p201_p7 = scmp.lt.s32.totalorder %s195_s19, %s195_s19 }
  0x13   :  { %v33_v2 = vadd.s32 128, %v32_v1  ;;  %v264_v3 = vmul.u32.u64.low 4042322161, %v32_v1  ;;  %v265_v4 = vmul.u32.u64.high 4042322161, %v32_v1, %v264_v3 }
  0x14   :  { %p202_p8 = por %p201_p7, %p200_p6 }
  0x15   :  { %v267_v5 = vmul.u32.u64.low 4042322161, %v33_v2  ;;  %v268_v6 = vmul.u32.u64.high 4042322161, %v33_v2, %v267_v5  ;;  %v40_v7 = vshrl.u32 %v265_v4, 4 }
  0x16   :  { %p203_p9 = pnand %p202_p8, %p196_p5 }
  0x17   :  { %v41_v8 = vmul.u32 17, %v40_v7  ;;  %v51_v9 = vshrl.u32 %v268_v6, 4 }
  0x19   :  { %v42_v10 = vsub.s32 %v32_v1, %v41_v8  ;;  %v52_v11 = vmul.u32 17, %v51_v9 }
  0x1b   :  { %v53_v12 = vsub.s32 %v33_v2, %v52_v11  ;;  %vm56_vm0 = vcmp.ne.s32.totalorder %v42_v10, 0  ;;  %vm58_vm1 = vcmp.lt.s32.totalorder %v42_v10, 0  ;;  %v62_v13 = vadd.s32 17, %v42_v10 }
  0x1c   :  { %vm60_vm2 = vmand %vm58_vm1, %vm56_vm0 }
  0x1d   :  { %vm57_vm3 = vcmp.ne.s32.totalorder %v53_v12, 0  ;;  %vm59_vm4 = vcmp.lt.s32.totalorder %v53_v12, 0  ;;  %v63_v15 = vadd.s32 17, %v53_v12  ;;  %v64_v16 = vsel %vm60_vm2, %v62_v13, %v42_v10 }
  0x1e   :  { %vm61_vm5 = vmand %vm59_vm4, %vm57_vm3  ;;  %vm274_vm6 = vcmp.eq.s32.totalorder %v64_v16, 0 }
  0x1f   :  { %v65_v19 = vsel %vm61_vm5, %v63_v15, %v53_v12  ;;  %v72_v20 = vsel %vm274_vm6, %v272_v14, -inf }
  0x20   :  { %vm281_vm7 = vcmp.eq.s32.totalorder %v65_v19, 0 }
  0x21   :  { %v73_v22 = vsel %vm281_vm7, %v27_v17, -inf }
  0x22   :  { %v74_v23 = vmax.f32 %v72_v20, %v73_v22 }
  0x24   :  { %75 = vmax.xlane.f32.xlu0 %v74_v23 }
  0xad   :  { %v76_v24 = vpop.xlane.xlu0 %75 }
  0xae   :  { %v77_v25 = vsub.f32 %v72_v20, %v76_v24  ;;  %v78_v26 = vsub.f32 %v73_v22, %v76_v24  ;;  %v92_v32 = vsub.f32 %v76_v24, %v272_v14  ;;  %v93_v33 = vsub.f32 %v76_v24, %v27_v17 }
  0xb0   :  { %v79_v27 = vmul.f32 1.442695, %v77_v25  ;;  %v81_v28 = vmul.f32 1.442695, %v78_v26  ;;  %v94_v34 = vsel %vm274_vm6, %v92_v32, 0.0  ;;  %v95_v35 = vsel %vm281_vm7, %v93_v33, 0.0 }
  0xb1   :  { %v98_v36 = vmul.f32 1.442695, %v94_v34  ;;  %v100_v37 = vmul.f32 1.442695, %v95_v35 }
  0xb2   :  { %163 = vpow2.f32 %v79_v27 }
  0xb3   :  { %165 = vpow2.f32 %v81_v28 }
  0xb4   :  { %167 = vpow2.f32 %v98_v36 }
  0xb5   :  { %169 = vpow2.f32 %v100_v37 }
  0xbf   :  { %v164_v29 = vpop.eup %163 }
  0xc0   :  { %v166_v30 = vpop.eup %165 }
  0xc1   :  { %v83_v31 = vadd.f32 %v166_v30, %v164_v29  ;;  %v168_v39 = vpop.eup %167 }
  0xc2   :  { %v170_v42 = vpop.eup %169 }
  0xc3   :  { %84 = vadd.xlane.f32.xlu0 %v83_v31 }
 0x14c   :  { %v85_v38 = vpop.xlane.xlu0 %84 }
 0x14d   :  { %v96_v40 = vmul.f32 %v85_v38, %v272_v14  ;;  %v97_v41 = vmul.f32 %v85_v38, %v27_v17  ;;  %171 = vrcp.f32 %v85_v38 }
 0x14f   :  { %v102_v43 = vmul.f32 %v168_v39, %v96_v40  ;;  %v103_v44 = vmul.f32 %v170_v42, %v97_v41 }
 0x151   :  { %v104_v45 = vsel %vm274_vm6, %v102_v43, -inf  ;;  %v105_v46 = vsel %vm281_vm7, %v103_v44, -inf }
 0x152   :  { %v106_v47 = vmax.f32 %v104_v45, %v105_v46 }
 0x154   :  { %107 = vmax.xlane.f32.xlu1 %v106_v47 }
 0x15a   :  { %v172_v49 = vpop.eup %171 }
 0x15b   :  { %v87_v50 = vmul.f32 %v172_v49, %v85_v38 }
 0x15d   :  { %v88_v51 = vsub.f32 2.0, %v87_v50 }
 0x15f   :  { %v89_v54 = vmul.f32 %v172_v49, %v88_v51 }
 0x161   :  { %v90_v59 = vmul.f32 %v164_v29, %v89_v54  ;;  %v91_v60 = vmul.f32 %v166_v30, %v89_v54 }
 0x1dd   :  { %v108_v48 = vpop.xlane.xlu1 %107 }
 0x1de   :  { %173 = vrcp.f32 %v108_v48 }
 0x1eb   :  { %v174_v52 = vpop.eup %173 }
 0x1ec   :  { %v110_v53 = vmul.f32 %v174_v52, %v108_v48 }
 0x1ee   :  { %v111_v55 = vsub.f32 2.0, %v110_v53 }
 0x1f0   :  { %v112_v58 = vmul.f32 %v174_v52, %v111_v55 }
 0x1f2   :  { %v113_v61 = vmul.f32 %v112_v58, %v272_v14  ;;  %v114_v62 = vmul.f32 %v112_v58, %v27_v17  ;;  %v119_v63 = vmul.f32 %v112_v58, %v29_v56  ;;  %v120_v0 = vmul.f32 %v112_v58, %v30_v57 }
 0x1f4   :  { %v115_v1 = vsel %vm274_vm6, %v90_v59, %v113_v61  ;;  %v116_v2 = vsel %vm281_vm7, %v91_v60, %v114_v62  ;;  %v121_v3 = vsel %vm274_vm6, 0.0, %v119_v63  ;;  %v122_v4 = vsel %vm281_vm7, 0.0, %v120_v0 }
 0x1f5   :  { %117 = vst [vmem:[#allocation5] sm:$0xff] %v115_v1  ;;  %118 = vst [vmem:[#allocation5 + $0x8] sm:$0xff] %v116_v2 }
 0x1f6   :  { %123 = vst [vmem:[#allocation6] sm:$0xff] %v121_v3  ;;  %124 = vst [vmem:[#allocation6 + $0x8] sm:$0xff] %v122_v4 }
 0x1f7   :  { %206 = shalt.err (!%p203_p9)
}
 0x1f8   :  { %134 = dma.vmem_to_hbm [thread:$0]  %s132_s16, 256, %s313_s1, [#allocation4]  }
 0x1f9   :  { %s215_s22 = scalar_lea.vmem %s142_s18, 256  ;;  %p220_p11 = scmp.lt.s32.totalorder %s142_s18, %s142_s18 }
 0x1fa   :  { %p216_p10 = scmp.ne.s32.totalorder %s142_s18, %s215_s22  ;;  %p221_p12 = scmp.lt.s32.totalorder %s215_s22, %s215_s22 }
 0x1fc   :  { %p222_p13 = por %p221_p12, %p220_p11 }
 0x1fe   :  { %p223_p0 = pnand %p222_p13, %p216_p10 }
 0x200   :  { %226 = shalt.err (!%p223_p0)
}
 0x201   :  { %144 = dma.vmem_to_hbm [thread:$0]  %s142_s18, 256, %s314_s2, [#allocation7]  }
 0x202   :  { %237 = dma.done.wait [#allocation4], 256  }
 0x203   :  { %238 = vsyncadd [#allocation4], 4294967040 }
 0x204   :  { %239 = dma.done.wait [#allocation7], 256  }
 0x205   :  { %240 = vsyncadd [#allocation7], 4294967040 }
 0x206   :  { %151 = vsyncpa [#allocation3], 1 }
 0x207   :  { %152 = vsyncpa [#allocation4], 1 }
 0x208   :  { %153 = vsyncpa [#allocation7], 1 }

</bundles_post_ra>
